<compile_context>
chip_gen: v5e
topology: v5e:2x2
jax: 0.10.0
libtpu: 0.0.40
codegen_flags: <defaults>
</compile_context>

<pallas_src>
import functools

import numpy as np
import jax
import jax.numpy as jnp
from jax.experimental import pallas as pl
from jax.experimental.pallas import tpu as pltpu

MARGIN = 1.0
EPS = 1e-9
_LANES = 128
# Total budget for double-buffered inputs + padded target buffers + in-kernel
# f32 temporaries.  Kept under v5e's 16 MiB default scoped-VMEM limit (v6e/v7x
# defaults are 32 MiB), so no explicit vmem_limit_bytes is needed anywhere.
_VMEM_BUDGET_BYTES = 12 * 1024 * 1024


def _sublane_quantum(itemsize):
    # f32 -> 8, bf16 -> 16, int8/fp8 -> 32 (sublane packing of the input dtype).
    return 8 * max(1, 4 // int(itemsize))


def _choose_tile_rows(rows, lane_width, itemsize, tgt_width):
    lane_pad = -(-lane_width // _LANES) * _LANES
    tgt_pad = -(-tgt_width // _LANES) * _LANES
    per_row = (2 * 2 * lane_pad * itemsize   # o1 + o2, double-buffered, native dtype
               + 2 * tgt_pad * 4             # f32 target block, double-buffered, lane-padded
               + 4 * lane_pad * 4)           # in-kernel f32 temporaries (upcasts/diff/sq/...)
    return max(_sublane_quantum(itemsize), _VMEM_BUDGET_BYTES // per_row)


def _losses_from_distances(dist, tgt, margin, eps):
    d = jnp.sqrt(dist + eps)
    hinge = jnp.maximum(margin - d, 0.0)
    return 0.5 * (tgt * dist + (1.0 - tgt) * hinge * hinge)


def _emit_block_partial(out_ref, losses, *, valid_rows, tile_rows):
    """Write this grid step's partial loss sum into its private output block."""
    i = pl.program_id(0)

    def _store(vals):
        out_ref[...] = jnp.full((1, 1, _LANES), jnp.sum(vals), dtype=jnp.float32)

    if valid_rows % tile_rows != 0:
        last = pl.num_programs(0) - 1

        @pl.when(i == last)
        def _tail():
            # Mask padded tail rows (jnp.where is a select, so garbage/NaN in
            # the out-of-range rows cannot leak into the sum).
            row = (jax.lax.broadcasted_iota(jnp.int32, losses.shape, 0)
                   + i * tile_rows)
            _store(jnp.where(row < valid_rows, losses, 0.0))

        @pl.when(i != last)
        def _full():
            _store(losses)
    else:
        _store(losses)


def _contrastive_slab_kernel(o1_ref, o2_ref, tgt_ref, seg_ref, out_ref, *,
                             margin, eps, valid_rows, tile_rows):
    # Lane-dense path: o1/o2 blocks are (T, 128) slabs, each slab row holds
    # R = 128 // D original rows; tgt block is (T, R) f32; seg is a (128, R)
    # block-diagonal 0/1 matrix; out block is (1, 1, 128) f32.
    o1 = o1_ref[...].astype(jnp.float32)
    o2 = o2_ref[...].astype(jnp.float32)
    diff = o2 - o1
    sq = diff * diff                                              # (T, 128)

    # Per-original-row squared distances via a segment-sum matmul on the idle
    # MXU.  hi is exactly bf16-representable and lo is ~2^-9 smaller, so the
    # result stays f32-accurate regardless of the default f32 matmul rounding.
    seg = seg_ref[...]                                            # (128, R)
    hi = sq.astype(jnp.bfloat16).astype(jnp.float32)
    lo = sq - hi
    dist = (jnp.dot(hi, seg, preferred_element_type=jnp.float32)
            + jnp.dot(lo, seg, preferred_element_type=jnp.float32))  # (T, R)

    losses = _losses_from_distances(dist, tgt_ref[...], margin, eps)  # (T, R)
    _emit_block_partial(out_ref, losses,
                        valid_rows=valid_rows, tile_rows=tile_rows)


def _contrastive_rows_kernel(o1_ref, o2_ref, tgt_ref, out_ref, *,
                             margin, eps, valid_rows, tile_rows):
    # Standard path: o1/o2 blocks are (T, D); tgt block is (T, 1) f32.
    o1 = o1_ref[...].astype(jnp.float32)
    o2 = o2_ref[...].astype(jnp.float32)
    diff = o2 - o1
    dist = jnp.sum(diff * diff, axis=1, keepdims=True)            # (T, 1)
    losses = _losses_from_distances(dist, tgt_ref[...], margin, eps)
    _emit_block_partial(out_ref, losses,
                        valid_rows=valid_rows, tile_rows=tile_rows)


def contrastive_loss(output1, output2, target, margin=MARGIN,
                     size_average=True, tile_rows=None):
    """output1, output2: (B, D) float/bf16; target: (B,) of 0/1. Scalar loss."""
    B, D = output1.shape
    assert output2.shape == (B, D)
    itemsize = jnp.dtype(output1.dtype).itemsize

    # Lane-dense slab layout when D is a small power-of-two-ish divisor of 128
    # and B packs evenly into 128-lane slab rows.
    lane_dense = (D < _LANES) and (_LANES % D == 0) and ((B * D) % _LANES == 0)

    if lane_dense:
        R = _LANES // D                          # original rows per slab row
        rows = (B * D) // _LANES                 # slab rows
        width, tgt_w = _LANES, R
        o1 = output1.reshape(rows, _LANES)
        o2 = output2.reshape(rows, _LANES)
        tgt = target.reshape(rows, R).astype(jnp.float32)
        seg = jnp.asarray(
            (np.arange(_LANES)[:, None] // D) == np.arange(R)[None, :],
            dtype=jnp.float32)                   # (128, R) block-diagonal ones
    else:
        rows, width, tgt_w = B, D, 1
        o1, o2 = output1, output2
        tgt = target.reshape(B, 1).astype(jnp.float32)

    sub = _sublane_quantum(itemsize)
    if tile_rows is None:
        tile_rows = _choose_tile_rows(rows, width, itemsize, tgt_w)
    if tile_rows >= rows:
        tile_rows = rows                         # single full block
    else:
        tile_rows = max(sub, tile_rows - tile_rows % sub)
    num_blocks = -(-rows // tile_rows)

    in_specs = [
        pl.BlockSpec((tile_rows, width), lambda i: (i, 0)),
        pl.BlockSpec((tile_rows, width), lambda i: (i, 0)),
        pl.BlockSpec((tile_rows, tgt_w), lambda i: (i, 0)),
    ]
    inputs = [o1, o2, tgt]
    if lane_dense:
        # Same block for every step -> DMA'd once and kept resident.
        in_specs.append(pl.BlockSpec((_LANES, tgt_w), lambda i: (0, 0)))
        inputs.append(seg)
        kernel_fn = _contrastive_slab_kernel
    else:
        kernel_fn = _contrastive_rows_kernel

    kernel = functools.partial(
        kernel_fn, margin=float(margin), eps=EPS,
        valid_rows=rows, tile_rows=tile_rows)

    cost = pl.CostEstimate(
        flops=5 * B * D + 12 * B,
        transcendentals=B,                       # one sqrt per row
        bytes_accessed=2 * B * D * itemsize + B * 4 + num_blocks * _LANES * 4)

    partials = pl.pallas_call(
        kernel,
        out_shape=jax.ShapeDtypeStruct((num_blocks, 1, _LANES), jnp.float32),
        grid=(num_blocks,),
        in_specs=in_specs,
        out_specs=pl.BlockSpec((1, 1, _LANES), lambda i: (i, 0, 0)),
        compiler_params=pltpu.CompilerParams(
            dimension_semantics=("parallel",)),
        cost_estimate=cost,
    )(*inputs)

    total = jnp.sum(partials[:, 0, 0], dtype=jnp.float32)
    if size_average:
        total = total / B
    return total


def contrastive_loss_ref(output1, output2, target, margin=MARGIN, size_average=True):
    # Pure-JAX reference mirroring the PyTorch module.
    o1 = output1.astype(jnp.float32)
    o2 = output2.astype(jnp.float32)
    distances = jnp.sum((o2 - o1) ** 2, axis=1)
    t = target.astype(jnp.float32)
    hinge = jnp.maximum(margin - jnp.sqrt(distances + EPS), 0.0)
    losses = 0.5 * (t * distances + (1.0 - t) * hinge ** 2)
    return jnp.mean(losses) if size_average else jnp.sum(losses)


if __name__ == "__main__":
    key = jax.random.PRNGKey(0)
    k1, k2, k3 = jax.random.split(key, 3)

    # Primary small shape: lane-dense slab path (D=32 -> 4 rows per slab row).
    B, D = 8, 32
    o1 = jax.random.normal(k1, (B, D), dtype=jnp.float32)
    o2 = jax.random.normal(k2, (B, D), dtype=jnp.float32)
    tgt = jax.random.bernoulli(k3, 0.5, (B,)).astype(jnp.int32)

    loss = jax.block_until_ready(contrastive_loss(o1, o2, tgt))
    ref = contrastive_loss_ref(o1, o2, tgt)
    assert jnp.allclose(loss, ref, rtol=1e-5, atol=1e-5), (loss, ref)

    loss_sum = jax.block_until_ready(
        contrastive_loss(o1, o2, tgt, size_average=False))
    ref_sum = contrastive_loss_ref(o1, o2, tgt, size_average=False)
    assert jnp.allclose(loss_sum, ref_sum, rtol=1e-5, atol=1e-5), (loss_sum, ref_sum)

    # Lane-dense path: multi-block grid + slab-row tail masking.
    B2, D2 = 40, 32
    o1b = jax.random.normal(jax.random.PRNGKey(1), (B2, D2), dtype=jnp.float32)
    o2b = jax.random.normal(jax.random.PRNGKey(2), (B2, D2), dtype=jnp.float32)
    tb = jax.random.bernoulli(jax.random.PRNGKey(3), 0.5, (B2,)).astype(jnp.int32)
    loss2 = jax.block_until_ready(contrastive_loss(o1b, o2b, tb, tile_rows=8))
    ref2 = contrastive_loss_ref(o1b, o2b, tb)
    assert jnp.allclose(loss2, ref2, rtol=1e-5, atol=1e-5), (loss2, ref2)

    # Standard (row-tiled) path: D == lane width, multi-block + row tail.
    B3, D3 = 40, 128
    o1c = jax.random.normal(jax.random.PRNGKey(4), (B3, D3), dtype=jnp.float32)
    o2c = jax.random.normal(jax.random.PRNGKey(5), (B3, D3), dtype=jnp.float32)
    tc = jax.random.bernoulli(jax.random.PRNGKey(6), 0.5, (B3,)).astype(jnp.int32)
    loss3 = jax.block_until_ready(contrastive_loss(o1c, o2c, tc, tile_rows=16))
    ref3 = contrastive_loss_ref(o1c, o2c, tc)
    assert jnp.allclose(loss3, ref3, rtol=1e-5, atol=1e-5), (loss3, ref3)

    # Standard path fallback: D does not divide the lane width.
    B4, D4 = 24, 96
    o1d = jax.random.normal(jax.random.PRNGKey(7), (B4, D4), dtype=jnp.float32)
    o2d = jax.random.normal(jax.random.PRNGKey(8), (B4, D4), dtype=jnp.float32)
    td = jax.random.bernoulli(jax.random.PRNGKey(9), 0.5, (B4,)).astype(jnp.int32)
    loss4 = jax.block_until_ready(contrastive_loss(o1d, o2d, td))
    ref4 = contrastive_loss_ref(o1d, o2d, td)
    assert jnp.allclose(loss4, ref4, rtol=1e-5, atol=1e-5), (loss4, ref4)

    # bf16 inputs: native-dtype DMA, f32 math inside the kernel.
    loss_bf = jax.block_until_ready(
        contrastive_loss(o1.astype(jnp.bfloat16), o2.astype(jnp.bfloat16), tgt))
    ref_bf = contrastive_loss_ref(o1.astype(jnp.bfloat16),
                                  o2.astype(jnp.bfloat16), tgt)
    assert jnp.allclose(loss_bf, ref_bf, rtol=1e-4, atol=1e-4), (loss_bf, ref_bf)

    print("KERNEL_OK")
</pallas_src>

<mosaic_0001>
module attributes {stable_mosaic.version = 11 : i64} {
  func.func @_contrastive_slab_kernel(%arg0: i32, %arg1: memref<2x128xf32, #tpu.memory_space<vmem>>, %arg2: memref<2x128xf32, #tpu.memory_space<vmem>>, %arg3: memref<2x4xf32, #tpu.memory_space<vmem>>, %arg4: memref<128x4xf32, #tpu.memory_space<vmem>>, %arg5: memref<1x1x128xf32, #tpu.memory_space<vmem>>) attributes {dimension_semantics = [#tpu.dimension_semantics<parallel>], iteration_bounds = array<i64: 1>, scalar_prefetch = 0 : i64, scratch_operands = 0 : i64, tpu.core_type = #tpu.core_type<tc>, window_params = [{transform_indices = @transform_0, window_bounds = array<i64: 2, 128>}, {transform_indices = @transform_1, window_bounds = array<i64: 2, 128>}, {transform_indices = @transform_2, window_bounds = array<i64: 2, 4>}, {pipeline_mode = #tpu.pipeline_mode<synchronous>, transform_indices = @transform_3, window_bounds = array<i64: 128, 4>}, {transform_indices = @transform_4, window_bounds = array<i64: 1, 1, 128>}]} {
    %c0 = arith.constant 0 : index
    %c0_0 = arith.constant 0 : index
    %0 = vector.load %arg1[%c0, %c0_0] : memref<2x128xf32, #tpu.memory_space<vmem>>, vector<2x128xf32>
    %c0_1 = arith.constant 0 : index
    %c0_2 = arith.constant 0 : index
    %1 = vector.load %arg2[%c0_1, %c0_2] : memref<2x128xf32, #tpu.memory_space<vmem>>, vector<2x128xf32>
    %2 = arith.subf %1, %0 : vector<2x128xf32>
    %3 = arith.mulf %2, %2 : vector<2x128xf32>
    %c0_3 = arith.constant 0 : index
    %c0_4 = arith.constant 0 : index
    %4 = vector.load %arg4[%c0_3, %c0_4] : memref<128x4xf32, #tpu.memory_space<vmem>>, vector<128x4xf32>
    %5 = arith.truncf %3 : vector<2x128xf32> to vector<2x128xbf16>
    %6 = arith.extf %5 : vector<2x128xbf16> to vector<2x128xf32>
    %7 = arith.subf %3, %6 : vector<2x128xf32>
    %cst = arith.constant dense<0.000000e+00> : vector<2x4xf32>
    %8 = tpu.matmul %6, %4, %cst {dimension_numbers = #tpu.dot_dimension_numbers<[1], [0], [0], [1], [0, 0, 1, 1], [], []>} : vector<2x128xf32>, vector<128x4xf32>, vector<2x4xf32> -> vector<2x4xf32>
    %cst_5 = arith.constant dense<0.000000e+00> : vector<2x4xf32>
    %9 = tpu.matmul %7, %4, %cst_5 {dimension_numbers = #tpu.dot_dimension_numbers<[1], [0], [0], [1], [0, 0, 1, 1], [], []>} : vector<2x128xf32>, vector<128x4xf32>, vector<2x4xf32> -> vector<2x4xf32>
    %10 = arith.addf %8, %9 : vector<2x4xf32>
    %c0_6 = arith.constant 0 : index
    %c0_7 = arith.constant 0 : index
    %11 = vector.load %arg3[%c0_6, %c0_7] : memref<2x4xf32, #tpu.memory_space<vmem>>, vector<2x4xf32>
    %cst_8 = arith.constant 9.99999971E-10 : f32
    %12 = vector.broadcast %cst_8 : f32 to vector<2x4xf32>
    %13 = arith.addf %10, %12 : vector<2x4xf32>
    %14 = math.sqrt %13 : vector<2x4xf32>
    %cst_9 = arith.constant 1.000000e+00 : f32
    %15 = vector.broadcast %cst_9 : f32 to vector<2x4xf32>
    %16 = arith.subf %15, %14 : vector<2x4xf32>
    %cst_10 = arith.constant 0.000000e+00 : f32
    %17 = vector.broadcast %cst_10 : f32 to vector<2x4xf32>
    %18 = arith.maximumf %16, %17 : vector<2x4xf32>
    %19 = arith.mulf %11, %10 : vector<2x4xf32>
    %cst_11 = arith.constant 1.000000e+00 : f32
    %20 = vector.broadcast %cst_11 : f32 to vector<2x4xf32>
    %21 = arith.subf %20, %11 : vector<2x4xf32>
    %22 = arith.mulf %21, %18 : vector<2x4xf32>
    %23 = arith.mulf %22, %18 : vector<2x4xf32>
    %24 = arith.addf %19, %23 : vector<2x4xf32>
    %cst_12 = arith.constant 5.000000e-01 : f32
    %25 = vector.broadcast %cst_12 : f32 to vector<2x4xf32>
    %26 = arith.mulf %25, %24 : vector<2x4xf32>
    %27 = vector.shape_cast %26 : vector<2x4xf32> to vector<1x2x4xf32>
    %cst_13 = arith.constant dense<0.000000e+00> : vector<1xf32>
    %28 = vector.multi_reduction <add>, %27, %cst_13 [1, 2] : vector<1x2x4xf32> to vector<1xf32>
    %29 = vector.shape_cast %28 : vector<1xf32> to vector<1x1x1xf32>
    %30 = vector.extract %29[0, 0, 0] : f32 from vector<1x1x1xf32>
    %31 = vector.broadcast %30 : f32 to vector<1x1x128xf32>
    %c0_14 = arith.constant 0 : index
    %c0_15 = arith.constant 0 : index
    %c0_16 = arith.constant 0 : index
    %32 = vector.load %arg5[%c0_14, %c0_15, %c0_16] : memref<1x1x128xf32, #tpu.memory_space<vmem>>, vector<1x1x128xf32>
    tpu.vector_store %arg5[%c0_14, %c0_15, %c0_16], %31 {strides = array<i32>} : memref<1x1x128xf32, #tpu.memory_space<vmem>>, vector<1x1x128xf32>,
    return
  }
  func.func @transform_0(%arg0: i32) -> (i32, i32) {
    %c0_i32 = arith.constant 0 : i32
    %c0_i32_0 = arith.constant 0 : i32
    return %arg0, %c0_i32 : i32, i32
  }
  func.func @transform_1(%arg0: i32) -> (i32, i32) {
    %c0_i32 = arith.constant 0 : i32
    %c0_i32_0 = arith.constant 0 : i32
    return %arg0, %c0_i32 : i32, i32
  }
  func.func @transform_2(%arg0: i32) -> (i32, i32) {
    %c0_i32 = arith.constant 0 : i32
    %c0_i32_0 = arith.constant 0 : i32
    return %arg0, %c0_i32 : i32, i32
  }
  func.func @transform_3(%arg0: i32) -> (i32, i32) {
    %c0_i32 = arith.constant 0 : i32
    %c0_i32_0 = arith.constant 0 : i32
    %c0_i32_1 = arith.constant 0 : i32
    return %c0_i32, %c0_i32_0 : i32, i32
  }
  func.func @transform_4(%arg0: i32) -> (i32, i32, i32) {
    %c0_i32 = arith.constant 0 : i32
    %c0_i32_0 = arith.constant 0 : i32
    %c0_i32_1 = arith.constant 0 : i32
    return %arg0, %c0_i32, %c0_i32_0 : i32, i32, i32
  }
}

</mosaic_0001>

<bundles_post_ra>
// kernel: tpu_custom_call.1
= control target key start
LH: loop header
LB: loop body
LE: loop exit
PB: predicated region body
PF: predicated region fallthrough
CT: control target
= control target key end

     0   :  { %s249_s0 = inlined_call_operand.vmem [shape: f32[2,128], index: 0, kind: input, shape index: {}]   ;;  %s250_s1 = inlined_call_operand.vmem [shape: f32[2,128], index: 1, kind: input, shape index: {}]   ;;  %s251_s2 = inlined_call_operand.vmem [shape: f32[2,4], index: 2, kind: input, shape index: {}]   ;;  %s252_s3 = inlined_call_operand.vmem [shape: f32[128,4], index: 3, kind: input, shape index: {}]   ;;  %s253_s4 = inlined_call_operand.hbm [shape: f32[1,1,128], index: 4, kind: output, shape index: {}]  }
   0x1   :  { %v37_v0 = vld [vmem:[%s252_s3 + $0x78] sm:$0xff]  ;;  %v36_v1 = vld [vmem:[%s252_s3 + $0x70] sm:$0xff]  ;;  %v35_v2 = vld [vmem:[%s252_s3 + $0x68] sm:$0xff] }
   0x2   :  { %41 = vmatpush.msra.mxu0 %v37_v0  ;;  %61 = vmatpush.msra.mxu1 %v37_v0  ;;  %v34_v3 = vld [vmem:[%s252_s3 + $0x60] sm:$0xff]  ;;  %v33_v4 = vld [vmem:[%s252_s3 + $0x58] sm:$0xff] }
   0x4   :  { %42 = vmatpush.msra.mxu0 %v36_v1  ;;  %62 = vmatpush.msra.mxu1 %v36_v1 }
   0x6   :  { %43 = vmatpush.msra.mxu0 %v35_v2  ;;  %63 = vmatpush.msra.mxu1 %v35_v2 }
   0x7   :  { %9 = vsyncpa [#allocation3], 0  ;;  %v32_v5 = vld [vmem:[%s252_s3 + $0x50] sm:$0xff]  ;;  %v18_v6 = vld [vmem:[%s249_s0] sm:$0x3]  ;;  %vm103_vm2 = vcmask 25600  }
   0x8   :  { %44 = vmatpush.msra.mxu0 %v34_v3  ;;  %64 = vmatpush.msra.mxu1 %v34_v3  ;;  %v19_v7 = vld [vmem:[%s250_s1] sm:$0x3]  ;;  %v31_v8 = vld [vmem:[%s252_s3 + $0x48] sm:$0xff]  ;;  %v29_v11 = vld [vmem:[%s252_s3 + $0x38] sm:$0xff]  ;;  %s123_s27 = sshll.u32 %s253_s4, 4  ;;  %s124_s27 = int_to_ptr.hbm [resolvable:$true] %s123_s27 }
   0x9   :  { %v30_v9 = vld [vmem:[%s252_s3 + $0x40] sm:$0xff]  ;;  %v20_v10 = vsub.f32 %v19_v7, %v18_v6  ;;  %v28_v12 = vld [vmem:[%s252_s3 + $0x30] sm:$0xff]  ;;  %v27_v14 = vld [vmem:[%s252_s3 + $0x28] sm:$0xff] }
   0xa   :  { %45 = vmatpush.msra.mxu0 %v33_v4  ;;  %65 = vmatpush.msra.mxu1 %v33_v4  ;;  %v26_v15 = vld [vmem:[%s252_s3 + $0x20] sm:$0xff]  ;;  %v25_v17 = vld [vmem:[%s252_s3 + $0x18] sm:$0xff]  ;;  %v24_v18 = vld [vmem:[%s252_s3 + $0x10] sm:$0xff] }
   0xb   :  { %v21_v13 = vmul.f32 %v20_v10, %v20_v10  ;;  %v23_v20 = vld [vmem:[%s252_s3 + $0x8] sm:$0xff]  ;;  %v22_v21 = vld [vmem:[%s252_s3] sm:$0xff] }
   0xc   :  { %46 = vmatpush.msra.mxu0 %v32_v5  ;;  %66 = vmatpush.msra.mxu1 %v32_v5  ;;  %v81_v36 = vld [vmem:[%s251_s2] sm:$0x3]  ;;  %s163_s2 = smov [#allocation2]  }
   0xd   :  { %v38_v16 = vpack.c.bf16 %v21_v13, %v21_v13  ;;  %v98_v38 = vsub.f32 1.0, %v81_v36  ;;  %s121_s24 = sshll.u32 %s163_s2, 4  ;;  %s122_s24 = int_to_ptr.vmem [resolvable:$true] %s121_s24 }
   0xe   :  { %47 = vmatpush.msra.mxu0 %v31_v8  ;;  %67 = vmatpush.msra.mxu1 %v31_v8 }
   0xf   :  { %v39_v19 = vunpack.c.l.bf16 %v38_v16 }
  0x10   :  { %48 = vmatpush.msra.mxu0 %v30_v9  ;;  %68 = vmatpush.msra.mxu1 %v30_v9 }
  0x11   :  { %v40_v22 = vsub.f32 %v21_v13, %v39_v19 }
  0x12   :  { %49 = vmatpush.msra.mxu0 %v29_v11  ;;  %69 = vmatpush.msra.mxu1 %v29_v11 }
  0x14   :  { %50 = vmatpush.msra.mxu0 %v28_v12  ;;  %70 = vmatpush.msra.mxu1 %v28_v12 }
  0x16   :  { %51 = vmatpush.msra.mxu0 %v27_v14  ;;  %71 = vmatpush.msra.mxu1 %v27_v14 }
  0x18   :  { %52 = vmatpush.msra.mxu0 %v26_v15  ;;  %72 = vmatpush.msra.mxu1 %v26_v15 }
  0x1a   :  { %53 = vmatpush.msra.mxu0 %v25_v17  ;;  %73 = vmatpush.msra.mxu1 %v25_v17 }
  0x1c   :  { %54 = vmatpush.msra.mxu0 %v24_v18  ;;  %74 = vmatpush.msra.mxu1 %v24_v18 }
  0x1e   :  { %55 = vmatpush.msra.mxu0 %v23_v20  ;;  %75 = vmatpush.msra.mxu1 %v23_v20 }
  0x20   :  { %56 = vmatpush.msra.mxu0 %v22_v21  ;;  %76 = vmatpush.msra.mxu1 %v22_v21 }
  0x21   :  { %57 = vmatmul.f32.vlgmr.msra.gmra.mxu0 %v40_v22  ;;  %77 = vmatmul.f32.vlgmr.msra.gmra.mxu1 %v39_v19 }
  0x9e   :  { %v58_v23 = vpop.f32.mrf.mxu0  ;;  %v78_v24 = vpop.f32.mrf.mxu1 }
  0x9f   :  { %v79_v25 = vadd.f32 %v78_v24, %v58_v23 }
  0xa1   :  { %v82_v26 = vadd.f32 1e-09, %v79_v25  ;;  %v97_v42 = vmul.f32 %v81_v36, %v79_v25 }
  0xa3   :  { %135 = vrsqrt.f32 %v82_v26  ;;  %vm90_vm0 = vcmp.eq.f32.partialorder %v82_v26, inf  ;;  %v93_v34 = vand.u32 2147483648, %v82_v26  ;;  %vm92_vm1 = vcmp.eq.f32.partialorder %v82_v26, 0.0 }
  0xa9   :  { %v136_v27 = vpop.eup %135 }
  0xaa   :  { %v84_v28 = vmul.f32 %v136_v27, %v82_v26 }
  0xac   :  { %v85_v29 = vmul.f32 %v136_v27, %v84_v28 }
  0xae   :  { %v86_v30 = vmul.f32 0.5, %v85_v29 }
  0xb0   :  { %v87_v31 = vsub.f32 1.5, %v86_v30 }
  0xb2   :  { %v88_v32 = vmul.f32 %v136_v27, %v87_v31 }
  0xb4   :  { %v89_v33 = vmul.f32 %v88_v32, %v82_v26 }
  0xb6   :  { %v91_v35 = vsel %vm90_vm0, %v82_v26, %v89_v33 }
  0xb7   :  { %v94_v37 = vsel %vm92_vm1, %v93_v34, %v91_v35 }
  0xb8   :  { %v95_v39 = vsub.f32 1.0, %v94_v37 }
  0xba   :  { %v96_v40 = vmax.f32 %v95_v39, 0.0 }
  0xbc   :  { %v99_v41 = vmul.f32 %v98_v38, %v96_v40 }
  0xbe   :  { %v100_v43 = vmul.f32 %v99_v41, %v96_v40 }
  0xc0   :  { %v101_v44 = vadd.f32 %v100_v43, %v97_v42 }
  0xc2   :  { %v102_v45 = vmul.f32 0.5, %v101_v44 }
  0xc4   :  { %v104_v46 = vsel %vm103_vm2, %v102_v45, 0.0 }
  0xc5   :  { %105 = vadd.xlane.f32.xlu0 %v104_v46 }
 0x138   :  { %v106_v47 = vpop.xlane.xlu0 %105 }
 0x139   :  { %v107_v48 = vrot.slane %v106_v47, 4 }
 0x13b   :  { %v108_v49 = vadd.f32 %v107_v48, %v106_v47 }
 0x13d   :  { %v109_v50 = vrot.slane %v108_v49, 2 }
 0x13f   :  { %v110_v51 = vadd.f32 %v109_v50, %v108_v49 }
 0x141   :  { %v111_v52 = vrot.slane %v110_v51, 1 }
 0x143   :  { %v112_v53 = vadd.f32 %v111_v52, %v110_v51 }
 0x145   :  { %132 = vpush %v112_v53 }
 0x176   :  { %s133_s28 = spop %132 }
 0x177   :  { %v114_v54 = vstv %s133_s28 }
 0x178   :  { %115 = vst [vmem:[#allocation2] sm:$0x1] %v114_v54 }
 0x179   :  { %126 = dma.vmem_to_hbm [thread:$0]  %s122_s24, 16, %s124_s27, [#allocation3]  }
 0x17a   :  { %161 = dma.done.wait [#allocation3], 16  }
 0x17b   :  { %162 = vsyncadd [#allocation3], 4294967280 }
 0x17c   :  { %131 = vsyncpa [#allocation3], 1 }

</bundles_post_ra>
